<compile_context>
chip_gen: v7x
topology: tpu7x:2x2x1
jax: 0.10.0
libtpu: 0.0.40
codegen_flags: <defaults>
</compile_context>

<pallas_src>
import jax
import jax.numpy as jnp
from jax.experimental import pallas as pl
from jax.experimental.pallas import tpu as pltpu

HIDDEN_DIM = 32
VOCAB_SIZE = 12
EVAL_HIDDEN = 128
TM_MAX = 8192   # rows per tile; double-buffered x + out slab ~5 MiB fp32


def _evaluator_kernel(x_ref, wbig_ref, bbig_ref, we1_ref, be1_ref,
                      we2_ref, be2_ref, wfr_ref, out_ref):
    V = VOCAB_SIZE
    W = out_ref.shape[-1]                                                # V + H

    x = x_ref[...]                                                       # (tm, H)

    # Fused x-consuming matmuls: [sim_head | fusion_gate(hidden part)] -> (tm, V+H)
    # Logits occupy lanes [0, V); adj base (x @ w_fuse_h + b_fuse) occupies [V, V+H).
    y = jnp.dot(x, wbig_ref[...], preferred_element_type=jnp.float32) + bbig_ref[...]

    # Compile-time lane mask: True on the logit/prob lanes.
    lane = jax.lax.broadcasted_iota(jnp.int32, (1, W), 1)
    is_prob_lane = lane < V

    # Masked, numerically-stable softmax over the logit lanes.
    # All ops are full-slab-width (one vreg lane group), exact divide for parity.
    logits = jnp.where(is_prob_lane, y, -jnp.inf)
    m = jnp.max(logits, axis=-1, keepdims=True)
    e = jnp.exp(logits - m)                                              # adj lanes -> 0
    probs = e / jnp.sum(e, axis=-1, keepdims=True)                       # (tm, W)

    # eval_head: Linear(V,128) -> ReLU -> Linear(128,1) -> Sigmoid.
    # we1 was zero-padded to (V+H, 128); the padded rows meet exactly-zero prob lanes.
    h1 = jnp.dot(probs, we1_ref[...], preferred_element_type=jnp.float32) + be1_ref[...]
    h1 = jnp.maximum(h1, 0.0)                                            # (tm, 128)
    # N=1 matmul demoted to VPU multiply + XLU lane reduce; bias is an SMEM scalar.
    r = jnp.sum(h1 * we2_ref[...], axis=-1, keepdims=True) + be2_ref[0]  # (tm, 1)
    # Overflow-free sigmoid on the EUP: sigmoid(r) = 0.5*(1 + tanh(r/2)).
    rewards = 0.5 * (jnp.tanh(0.5 * r) + 1.0)

    # fusion_gate on cat([x, rewards]): x-part + b_fuse already sits in the adj
    # lanes of y; wfr is zero-padded on the prob lanes, so one broadcast FMA.
    adj = y + rewards * wfr_ref[...]                                     # (tm, W)

    # Single lane-merged output slab: probs in [0, V), adj in [V, V+H).
    out_ref[...] = jnp.where(is_prob_lane, probs, adj)


def prepare_params(params):
    """One-time parameter fusion, hoisted out of the per-call hot path."""
    (w_sim, b_sim, w_e1, b_e1, w_e2, b_e2, w_fuse, b_fuse) = params
    H, V = w_sim.shape
    w_fuse_h = w_fuse[:H, :]                                   # (H, H)   acts on x
    w_fuse_r = w_fuse[H:H + 1, :]                              # (1, H)   acts on reward
    w_big = jnp.concatenate([w_sim, w_fuse_h], axis=1)         # (H, V+H) logits first
    b_big = jnp.concatenate([b_sim, b_fuse]).reshape(1, -1)    # (1, V+H)
    w_e1_pad = jnp.pad(w_e1, ((0, H), (0, 0)))                 # (V+H, 128), rows >= V zero
    w_fr_pad = jnp.pad(w_fuse_r, ((0, 0), (V, 0)))             # (1, V+H), lanes < V zero
    return {
        "w_big": w_big,
        "b_big": b_big,
        "w_e1": w_e1_pad,
        "b_e1": b_e1.reshape(1, -1),                           # (1, 128)
        "w_e2": w_e2.reshape(1, -1),                           # (1, 128)
        "b_e2": b_e2.reshape(1),                               # (1,)  -> SMEM scalar
        "w_fr": w_fr_pad,
    }


def _round_up(x, m):
    return ((x + m - 1) // m) * m


@jax.jit
def predictive_self_evaluator(hidden_state, prepped):
    """hidden_state: (B, S, H) float32. Returns (adjusted_state, simulated_probs)."""
    B, S, H = hidden_state.shape
    V = VOCAB_SIZE
    W = V + H
    M = B * S
    x2d = hidden_state.reshape(M, H)

    # Even row split; grid length always even (>= 2) so both v7x TCs get work and
    # ragged M never pads nearly a full dead tile.
    n_tiles = max(2, -(-M // TM_MAX))
    if n_tiles % 2:
        n_tiles += 1
    tm = _round_up(-(-M // n_tiles), 8)
    m_pad = tm * n_tiles
    if m_pad != M:
        x2d = jnp.pad(x2d, ((0, m_pad - M), (0, 0)))  # zero rows: benign, sliced off

    def const(shape):
        return pl.BlockSpec(shape, lambda i: (0, 0))

    in_specs = [
        pl.BlockSpec((tm, H), lambda i: (i, 0)),                # x rows (pipelined)
        const((H, W)),                                          # fused weight
        const((1, W)),                                          # fused bias
        const((W, EVAL_HIDDEN)),                                # eval_head W1 (padded)
        const((1, EVAL_HIDDEN)),                                # eval_head b1
        const((1, EVAL_HIDDEN)),                                # eval_head W2 (as a row)
        pl.BlockSpec(memory_space=pltpu.MemorySpace.SMEM),      # eval_head b2 scalar
        const((1, W)),                                          # fusion reward row (padded)
    ]
    out_specs = pl.BlockSpec((tm, W), lambda i: (i, 0))         # merged [probs | adj]

    flops = m_pad * (2 * H * W + 2 * W * EVAL_HIDDEN + 2 * EVAL_HIDDEN + 6 * W)
    transcendentals = m_pad * (W + 1)
    bytes_accessed = 4 * (m_pad * (H + W)
                          + H * W + W
                          + W * EVAL_HIDDEN + 2 * EVAL_HIDDEN + 1 + W)

    out = pl.pallas_call(
        _evaluator_kernel,
        out_shape=jax.ShapeDtypeStruct((m_pad, W), jnp.float32),
        grid=(n_tiles,),
        in_specs=in_specs,
        out_specs=out_specs,
        compiler_params=pltpu.CompilerParams(
            dimension_semantics=("parallel",),
            vmem_limit_bytes=32 * 1024 * 1024),
        cost_estimate=pl.CostEstimate(flops=flops,
                                      transcendentals=transcendentals,
                                      bytes_accessed=bytes_accessed),
    )(
        x2d,
        prepped["w_big"], prepped["b_big"],
        prepped["w_e1"], prepped["b_e1"],
        prepped["w_e2"], prepped["b_e2"],
        prepped["w_fr"],
    )

    probs = out[:M, :V].reshape(B, S, V)
    adj = out[:M, V:].reshape(B, S, H)
    return adj, probs


def init_params(key, hidden_dim, vocab_size):
    """Deterministic synthetic init (uniform, PyTorch-Linear-style bounds)."""
    ks = jax.random.split(key, 8)

    def lin(kw, kb, fan_in, fan_out):
        bound = 1.0 / jnp.sqrt(fan_in)
        w = jax.random.uniform(kw, (fan_in, fan_out), jnp.float32, -bound, bound)
        b = jax.random.uniform(kb, (fan_out,), jnp.float32, -bound, bound)
        return w, b

    w_sim, b_sim = lin(ks[0], ks[1], hidden_dim, vocab_size)
    w_e1, b_e1 = lin(ks[2], ks[3], vocab_size, EVAL_HIDDEN)
    w_e2, b_e2 = lin(ks[4], ks[5], EVAL_HIDDEN, 1)
    w_fuse, b_fuse = lin(ks[6], ks[7], hidden_dim + 1, hidden_dim)
    return (w_sim, b_sim, w_e1, b_e1, w_e2, b_e2, w_fuse, b_fuse)


def _reference(hidden_state, params):
    (w_sim, b_sim, w_e1, b_e1, w_e2, b_e2, w_fuse, b_fuse) = params
    logits = hidden_state @ w_sim + b_sim
    probs = jax.nn.softmax(logits, axis=-1)
    h1 = jax.nn.relu(probs @ w_e1 + b_e1)
    rewards = jax.nn.sigmoid(h1 @ w_e2 + b_e2)  # (..., 1)
    aug = jnp.concatenate([hidden_state, rewards], axis=-1)
    adj = aug @ w_fuse + b_fuse
    return adj, probs


if __name__ == "__main__":
    key = jax.random.PRNGKey(0)
    k_x, k_p = jax.random.split(key)

    B, S, H = 2, 8, HIDDEN_DIM
    hidden_state = jax.random.normal(k_x, (B, S, H), jnp.float32)
    params = init_params(k_p, H, VOCAB_SIZE)

    # One-time weight fusion (hoisted out of the per-call hot path).
    prepped = prepare_params(params)

    adj, probs = predictive_self_evaluator(hidden_state, prepped)
    adj = jax.block_until_ready(adj)
    probs = jax.block_until_ready(probs)

    adj_ref, probs_ref = _reference(hidden_state, params)
    assert jnp.allclose(probs, probs_ref, atol=1e-3, rtol=1e-3), "simulated_probs mismatch"
    assert jnp.allclose(adj, adj_ref, atol=1e-3, rtol=1e-3), "adjusted_state mismatch"

    print("KERNEL_OK")
</pallas_src>

<mosaic_0001>
module attributes {stable_mosaic.version = 11 : i64} {
  func.func @_evaluator_kernel(%arg0: i32, %arg1: memref<8x32xf32, #tpu.memory_space<vmem>>, %arg2: memref<32x44xf32, #tpu.memory_space<vmem>>, %arg3: memref<1x44xf32, #tpu.memory_space<vmem>>, %arg4: memref<44x128xf32, #tpu.memory_space<vmem>>, %arg5: memref<1x128xf32, #tpu.memory_space<vmem>>, %arg6: memref<1x128xf32, #tpu.memory_space<vmem>>, %arg7: memref<1xf32, #tpu.memory_space<smem>>, %arg8: memref<1x44xf32, #tpu.memory_space<vmem>>, %arg9: memref<8x44xf32, #tpu.memory_space<vmem>>) attributes {dimension_semantics = [#tpu.dimension_semantics<parallel>], iteration_bounds = array<i64: 2>, scalar_prefetch = 0 : i64, scratch_operands = 0 : i64, tpu.core_type = #tpu.core_type<tc>, window_params = [{transform_indices = @transform_0, window_bounds = array<i64: 8, 32>}, {pipeline_mode = #tpu.pipeline_mode<synchronous>, transform_indices = @transform_1, window_bounds = array<i64: 32, 44>}, {pipeline_mode = #tpu.pipeline_mode<synchronous>, transform_indices = @transform_2, window_bounds = array<i64: 1, 44>}, {pipeline_mode = #tpu.pipeline_mode<synchronous>, transform_indices = @transform_3, window_bounds = array<i64: 44, 128>}, {pipeline_mode = #tpu.pipeline_mode<synchronous>, transform_indices = @transform_4, window_bounds = array<i64: 1, 128>}, {pipeline_mode = #tpu.pipeline_mode<synchronous>, transform_indices = @transform_5, window_bounds = array<i64: 1, 128>}, {transform_indices = @transform_6, window_bounds = array<i64: 1>}, {pipeline_mode = #tpu.pipeline_mode<synchronous>, transform_indices = @transform_7, window_bounds = array<i64: 1, 44>}, {transform_indices = @transform_8, window_bounds = array<i64: 8, 44>}]} {
    %c0 = arith.constant 0 : index
    %c0_0 = arith.constant 0 : index
    %0 = vector.load %arg1[%c0, %c0_0] : memref<8x32xf32, #tpu.memory_space<vmem>>, vector<8x32xf32>
    %c0_1 = arith.constant 0 : index
    %c0_2 = arith.constant 0 : index
    %1 = vector.load %arg2[%c0_1, %c0_2] : memref<32x44xf32, #tpu.memory_space<vmem>>, vector<32x44xf32>
    %cst = arith.constant dense<0.000000e+00> : vector<8x44xf32>
    %2 = tpu.matmul %0, %1, %cst {dimension_numbers = #tpu.dot_dimension_numbers<[1], [0], [0], [1], [0, 0, 1, 1], [], []>} : vector<8x32xf32>, vector<32x44xf32>, vector<8x44xf32> -> vector<8x44xf32>
    %c0_3 = arith.constant 0 : index
    %c0_4 = arith.constant 0 : index
    %3 = vector.load %arg3[%c0_3, %c0_4] : memref<1x44xf32, #tpu.memory_space<vmem>>, vector<1x44xf32>
    %4 = vector.broadcast %3 : vector<1x44xf32> to vector<8x44xf32>
    %5 = arith.addf %2, %4 : vector<8x44xf32>
    %6 = tpu.iota {dimensions = array<i32: 1>} : vector<1x44xi32>
    %c12_i32 = arith.constant 12 : i32
    %7 = vector.broadcast %c12_i32 : i32 to vector<1x44xi32>
    %8 = arith.cmpi slt, %6, %7 : vector<1x44xi32>
    %cst_5 = arith.constant 0xFF800000 : f32
    %9 = vector.shape_cast %8 : vector<1x44xi1> to vector<1x44xi1>
    %10 = vector.broadcast %9 : vector<1x44xi1> to vector<8x44xi1>
    %11 = vector.broadcast %cst_5 : f32 to vector<8x44xf32>
    %12 = arith.select %10, %5, %11 : vector<8x44xi1>, vector<8x44xf32>
    %cst_6 = arith.constant dense<0xFF800000> : vector<8xf32>
    %13 = vector.multi_reduction <maximumf>, %12, %cst_6 [1] : vector<8x44xf32> to vector<8xf32>
    %14 = vector.shape_cast %13 : vector<8xf32> to vector<8x1xf32>
    %15 = vector.broadcast %14 : vector<8x1xf32> to vector<8x44xf32>
    %16 = arith.subf %12, %15 : vector<8x44xf32>
    %17 = math.exp %16 : vector<8x44xf32>
    %cst_7 = arith.constant dense<0.000000e+00> : vector<8xf32>
    %18 = vector.multi_reduction <add>, %17, %cst_7 [1] : vector<8x44xf32> to vector<8xf32>
    %19 = vector.shape_cast %18 : vector<8xf32> to vector<8x1xf32>
    %20 = vector.broadcast %19 : vector<8x1xf32> to vector<8x44xf32>
    %21 = arith.divf %17, %20 : vector<8x44xf32>
    %c0_8 = arith.constant 0 : index
    %c0_9 = arith.constant 0 : index
    %22 = vector.load %arg4[%c0_8, %c0_9] : memref<44x128xf32, #tpu.memory_space<vmem>>, vector<44x128xf32>
    %cst_10 = arith.constant dense<0.000000e+00> : vector<8x128xf32>
    %23 = tpu.matmul %21, %22, %cst_10 {dimension_numbers = #tpu.dot_dimension_numbers<[1], [0], [0], [1], [0, 0, 1, 1], [], []>} : vector<8x44xf32>, vector<44x128xf32>, vector<8x128xf32> -> vector<8x128xf32>
    %c0_11 = arith.constant 0 : index
    %c0_12 = arith.constant 0 : index
    %24 = vector.load %arg5[%c0_11, %c0_12] : memref<1x128xf32, #tpu.memory_space<vmem>>, vector<1x128xf32>
    %25 = vector.broadcast %24 : vector<1x128xf32> to vector<8x128xf32>
    %26 = arith.addf %23, %25 : vector<8x128xf32>
    %cst_13 = arith.constant 0.000000e+00 : f32
    %27 = vector.broadcast %cst_13 : f32 to vector<8x128xf32>
    %28 = arith.maximumf %26, %27 : vector<8x128xf32>
    %c0_14 = arith.constant 0 : index
    %c0_15 = arith.constant 0 : index
    %29 = vector.load %arg6[%c0_14, %c0_15] : memref<1x128xf32, #tpu.memory_space<vmem>>, vector<1x128xf32>
    %30 = vector.broadcast %29 : vector<1x128xf32> to vector<8x128xf32>
    %31 = arith.mulf %28, %30 : vector<8x128xf32>
    %cst_16 = arith.constant dense<0.000000e+00> : vector<8xf32>
    %32 = vector.multi_reduction <add>, %31, %cst_16 [1] : vector<8x128xf32> to vector<8xf32>
    %33 = vector.shape_cast %32 : vector<8xf32> to vector<8x1xf32>
    %c0_17 = arith.constant 0 : index
    %34 = memref.load %arg7[%c0_17] : memref<1xf32, #tpu.memory_space<smem>>
    %35 = vector.broadcast %34 : f32 to vector<8x1xf32>
    %36 = arith.addf %33, %35 : vector<8x1xf32>
    %cst_18 = arith.constant 5.000000e-01 : f32
    %37 = vector.broadcast %cst_18 : f32 to vector<8x1xf32>
    %38 = arith.mulf %37, %36 : vector<8x1xf32>
    %39 = math.tanh %38 : vector<8x1xf32>
    %cst_19 = arith.constant 1.000000e+00 : f32
    %40 = vector.broadcast %cst_19 : f32 to vector<8x1xf32>
    %41 = arith.addf %39, %40 : vector<8x1xf32>
    %cst_20 = arith.constant 5.000000e-01 : f32
    %42 = vector.broadcast %cst_20 : f32 to vector<8x1xf32>
    %43 = arith.mulf %42, %41 : vector<8x1xf32>
    %c0_21 = arith.constant 0 : index
    %c0_22 = arith.constant 0 : index
    %44 = vector.load %arg8[%c0_21, %c0_22] : memref<1x44xf32, #tpu.memory_space<vmem>>, vector<1x44xf32>
    %45 = vector.broadcast %43 : vector<8x1xf32> to vector<8x44xf32>
    %46 = vector.broadcast %44 : vector<1x44xf32> to vector<8x44xf32>
    %47 = arith.mulf %45, %46 : vector<8x44xf32>
    %48 = arith.addf %5, %47 : vector<8x44xf32>
    %49 = vector.shape_cast %8 : vector<1x44xi1> to vector<1x44xi1>
    %50 = vector.broadcast %49 : vector<1x44xi1> to vector<8x44xi1>
    %51 = arith.select %50, %21, %48 : vector<8x44xi1>, vector<8x44xf32>
    %c0_23 = arith.constant 0 : index
    %c0_24 = arith.constant 0 : index
    %52 = vector.load %arg9[%c0_23, %c0_24] : memref<8x44xf32, #tpu.memory_space<vmem>>, vector<8x44xf32>
    tpu.vector_store %arg9[%c0_23, %c0_24], %51 {strides = array<i32>} : memref<8x44xf32, #tpu.memory_space<vmem>>, vector<8x44xf32>,
    return
  }
  func.func @transform_0(%arg0: i32) -> (i32, i32) {
    %c0_i32 = arith.constant 0 : i32
    %c0_i32_0 = arith.constant 0 : i32
    return %arg0, %c0_i32 : i32, i32
  }
  func.func @transform_1(%arg0: i32) -> (i32, i32) {
    %c0_i32 = arith.constant 0 : i32
    %c0_i32_0 = arith.constant 0 : i32
    %c0_i32_1 = arith.constant 0 : i32
    return %c0_i32, %c0_i32_0 : i32, i32
  }
  func.func @transform_2(%arg0: i32) -> (i32, i32) {
    %c0_i32 = arith.constant 0 : i32
    %c0_i32_0 = arith.constant 0 : i32
    %c0_i32_1 = arith.constant 0 : i32
    return %c0_i32, %c0_i32_0 : i32, i32
  }
  func.func @transform_3(%arg0: i32) -> (i32, i32) {
    %c0_i32 = arith.constant 0 : i32
    %c0_i32_0 = arith.constant 0 : i32
    %c0_i32_1 = arith.constant 0 : i32
    return %c0_i32, %c0_i32_0 : i32, i32
  }
  func.func @transform_4(%arg0: i32) -> (i32, i32) {
    %c0_i32 = arith.constant 0 : i32
    %c0_i32_0 = arith.constant 0 : i32
    %c0_i32_1 = arith.constant 0 : i32
    return %c0_i32, %c0_i32_0 : i32, i32
  }
  func.func @transform_5(%arg0: i32) -> (i32, i32) {
    %c0_i32 = arith.constant 0 : i32
    %c0_i32_0 = arith.constant 0 : i32
    %c0_i32_1 = arith.constant 0 : i32
    return %c0_i32, %c0_i32_0 : i32, i32
  }
  func.func @transform_6(%arg0: i32) -> i32 {
    %c0_i32 = arith.constant 0 : i32
    %c0_i32_0 = arith.constant 0 : i32
    return %c0_i32 : i32
  }
  func.func @transform_7(%arg0: i32) -> (i32, i32) {
    %c0_i32 = arith.constant 0 : i32
    %c0_i32_0 = arith.constant 0 : i32
    %c0_i32_1 = arith.constant 0 : i32
    return %c0_i32, %c0_i32_0 : i32, i32
  }
  func.func @transform_8(%arg0: i32) -> (i32, i32) {
    %c0_i32 = arith.constant 0 : i32
    %c0_i32_0 = arith.constant 0 : i32
    return %arg0, %c0_i32 : i32, i32
  }
}

</mosaic_0001>

<bundles_post_ra>
// kernel: predictive_self_evaluator.1
= control target key start
LH: loop header
LB: loop body
LE: loop exit
PB: predicated region body
PF: predicated region fallthrough
CT: control target
= control target key end

     0   :  { %s1183_s0 = inlined_call_operand.hbm [shape: f32[16,32], index: 0, kind: input, shape index: {}]   ;;  %s1184_s1 = inlined_call_operand.hbm [shape: f32[32,44], index: 1, kind: input, shape index: {}]   ;;  %s1185_s2 = inlined_call_operand.vmem [shape: f32[1,44], index: 2, kind: input, shape index: {}]   ;;  %s1186_s3 = inlined_call_operand.hbm [shape: f32[44,128], index: 3, kind: input, shape index: {}]   ;;  %s1187_s4 = inlined_call_operand.vmem [shape: f32[1,128], index: 4, kind: input, shape index: {}]   ;;  %s1188_s5 = inlined_call_operand.vmem [shape: f32[1,128], index: 5, kind: input, shape index: {}]   ;;  %s1189_s6 = inlined_call_operand.<no memory space> [shape: f32[1], index: 6, kind: input, shape index: {}]   ;;  %s1190_s7 = inlined_call_operand.vmem [shape: f32[1,44], index: 7, kind: input, shape index: {}]   ;;  %s1191_s8 = inlined_call_operand.vmem [shape: f32[16,44], index: 8, kind: output, shape index: {}]  }
   0x1   :  { %13 = sst [smem:[#allocation2]] %s1189_s6 }
   0x2   :  { %14 = vsyncpa [#allocation4], 0 }
   0x3   :  { %16 = vsyncpa [#allocation4 + $0x1], 0 }
   0x4   :  { %17 = vsyncpa [#allocation6], 0  ;;  %s988_s29 = smov 0   ;;  %s990_s30 = smov 0  }
   0x5   :  { %s992_s9 = smov 0   ;;  %s994_s10 = smov 0  }
   0x6 LB: > { %s1007_s6 = sadd.s32 4294967295, %s929_s10   ;;  %p43_p0 = scmp.ne.s32.totalorder %s921_s30, %s917_s29  ;;  %s929_s10 = sphi %s994_s10, %s1206_s10   ;;  %s925_s9 = sphi %s992_s9, %s1205_s9   ;;  %s921_s30 = sphi %s990_s30, %s1204_s30   ;;  %s917_s29 = sphi %s988_s29, %s1203_s29  }
   0x7   : > { %p1192_p1 = scmp.eq.s32.totalorder %s1007_s6, 0  ;;  %p659_p2 = scmp.ge.s32.totalorder %s929_s10, 1 }
   0x8   : > { %p227_p3 = scmp.lt.s32.totalorder %s929_s10, 3  ;;  %s931_s13 = smov [#allocation5]  }
   0x9   : > { %p1015_p4 = por %p1192_p1, %p43_p0  ;;  %s239_s14 = sshll.u32 %s931_s13, 4  ;;  %s240_s14 = int_to_ptr.vmem [resolvable:$true] %s239_s14 }
   0xa   : > { %p1019_p5 = pnand %p659_p2, %p227_p3  ;;  %s932_s16 = smov [#allocation7]  }
   0xb   : > { %s1195_s11 = scalar_select %p1015_p4, 1, 0 }
   0xc   : > { %s1196_s12 = scalar_select %p1019_p5, 1, 0 }
   0xd   : > { %p743_p6 = pneg %p1019_p5  ;;  %s255_s17 = sshll.u32 %s932_s16, 4  ;;  %s1031_s17 = int_to_ptr.vmem [resolvable:$true] %s255_s17 }
   0xe   : > { %s805_s20 = scalar_lea.hbm %s1184_s1, 512 }
   0xf   : > { %p1027_p7 = pnand %p743_p6, %p1192_p1  ;;  %p806_p8 = scmp.ne.s32.totalorder %s1184_s1, %s805_s20 }
  0x10   : > { %p812_p12 = scmp.lt.u32.totalorder %s805_s20, %s1184_s1 }
  0x11   : > { %p807_p9 = pneg %p1027_p7 }
  0x13   : > { %p808_p10 = pnand %p807_p9, %p806_p8 }
  0x15   : > { %p809_p11 = pneg %p808_p10 }
  0x17   : > { %p814_p13 = pnand %p812_p12, %p809_p11 }
  0x19   : > { %817 = shalt.err (!%p814_p13)
}
  0x1a   : > { %s818_s25 = scalar_lea.vmem %s240_s14, 512  ;;  %p826_p6 = scmp.lt.s32.totalorder %s240_s14, %s240_s14 }
  0x1b   : > { %p819_p0 = scmp.ne.s32.totalorder %s240_s14, %s818_s25  ;;  %p827_p1 = scmp.lt.s32.totalorder %s818_s25, %s818_s25 }
  0x1d   : > { %p821_p2 = pnand %p819_p0, %p807_p9  ;;  %p828_p4 = por %p827_p1, %p826_p6 }
  0x1f   : > { %p822_p3 = pneg %p821_p2 }
  0x21   : > { %p829_p5 = pnand %p828_p4, %p822_p3 }
  0x23   : > { %832 = shalt.err (!%p829_p5)
}
  0x24   : > { %s933_s26 = smov 128   ;;  %s934_s27 = smov 8  }
  0x25   : > { %746 = dma.hbm_to_vmem [thread:$0]  (!%p1027_p7), %s1184_s1, 512, %s240_s14, [#allocation6], %s933_s26, %s933_s26, %s934_s27  }
  0x26   : > { %s833_s18 = scalar_lea.hbm %s1186_s3, 768 }
  0x27   : > { %p834_p8 = scmp.ne.s32.totalorder %s1186_s3, %s833_s18  ;;  %p840_p5 = scmp.lt.u32.totalorder %s833_s18, %s1186_s3 }
  0x29   : > { %p836_p1 = pnand %p834_p8, %p807_p9 }
  0x2b   : > { %p837_p4 = pneg %p836_p1 }
  0x2d   : > { %p842_p10 = pnand %p840_p5, %p837_p4 }
  0x2f   : > { %845 = shalt.err (!%p842_p10)
}
  0x30   : > { %s846_s14 = scalar_lea.vmem %s1031_s17, 768  ;;  %p854_p0 = scmp.lt.s32.totalorder %s1031_s17, %s1031_s17 }
  0x31   : > { %p847_p11 = scmp.ne.s32.totalorder %s1031_s17, %s846_s14  ;;  %p855_p2 = scmp.lt.s32.totalorder %s846_s14, %s846_s14 }
  0x33   : > { %p849_p12 = pnand %p847_p11, %p807_p9  ;;  %p856_p3 = por %p855_p2, %p854_p0 }
  0x35   : > { %p850_p13 = pneg %p849_p12 }
  0x37   : > { %p857_p6 = pnand %p856_p3, %p850_p13 }
  0x39   : > { %860 = shalt.err (!%p857_p6)
}
  0x3a   : > { %749 = dma.hbm_to_vmem [thread:$0]  (!%p1027_p7), %s1186_s3, 768, %s1031_s17, [#allocation6], %s933_s26, %s933_s26, %s934_s27  }
  0x3b   : > { %s1081_s25 = sadd.s32 1, %s929_s10   ;;  %s30_s28 = sadd.s32 1, %s925_s9 }
  0x3c   : > { %s27_s15 = ssub.s32 %s929_s10, %s1081_s25  ;;  %p37_p9 = scmp.ne.s32.totalorder %s925_s9, %s921_s30 }
  0x3d   : > { %p28_p8 = scmp.eq.s32.totalorder %s27_s15, 0  ;;  %p38_p1 = scmp.eq.s32.totalorder %s929_s10, 0 }
  0x3e   : > { %p756_p4 = scmp.lt.s32.totalorder %s929_s10, 2  ;;  %s281_s29 = sand.u32 1, %s925_s9  }
  0x3f   : > { %s1092_s13 = scalar_select %p28_p8, %s925_s9, %s30_s28  }
  0x40   : > { %p39_p5 = por %p38_p1, %p37_p9  ;;  %s663_s16 = sshll.u32 %s281_s29, 3 }
  0x41   : > { %s664_s18 = sshll.u32 %s929_s10, 7  ;;  %s285_s17 = scalar_lea.vmem [#allocation3], %s663_s16 }
  0x42   : > { %s1098_s21 = scalar_lea.hbm %s1183_s0, %s664_s18  ;;  %s292_s26 = sshll.u32 %s285_s17, 4  ;;  %s1104_s26 = int_to_ptr.vmem [resolvable:$true] %s292_s26 }
  0x43   : > { %p1100_p7 = pnand %p756_p4, %p39_p5  ;;  %s282_s10 = scalar_lea.sflag [#allocation4], %s281_s29 }
  0x44   : > { %s861_s22 = scalar_lea.hbm %s1098_s21, 128  ;;  %s866_s24 = scalar_lea.hbm %s1183_s0, 256 }
  0x45   : > { %p862_p10 = scmp.ne.s32.totalorder %s1098_s21, %s861_s22  ;;  %p863_p11 = pneg %p1100_p7 }
  0x46   : > { %p867_p0 = scmp.lt.u32.totalorder %s1098_s21, %s1183_s0  ;;  %p868_p2 = scmp.lt.u32.totalorder %s866_s24, %s861_s22 }
  0x47   : > { %p864_p12 = pnand %p863_p11, %p862_p10  ;;  %p870_p6 = scmp.lt.u32.totalorder %s861_s22, %s1098_s21 }
  0x48   : > { %p869_p3 = por %p868_p2, %p867_p0 }
  0x49   : > { %p865_p13 = pneg %p864_p12 }
  0x4a   : > { %p871_p9 = por %p870_p6, %p869_p3 }
  0x4c   : > { %p872_p8 = pnand %p871_p9, %p865_p13 }
  0x4e   : > { %875 = shalt.err (!%p872_p8)
}
  0x4f   : > { %s876_s29 = scalar_lea.vmem %s1104_s26, 128  ;;  %s935_s16 = smov [#allocation3]  }
  0x50   : > { %p877_p1 = scmp.ne.s32.totalorder %s1104_s26, %s876_s29  ;;  %s881_s18 = sshll.u32 %s935_s16, 4  ;;  %s882_s18 = int_to_ptr.vmem [resolvable:$false] %s881_s18 }
  0x51   : > { %s883_s19 = scalar_lea.vmem %s882_s18, 256  ;;  %p884_p10 = scmp.lt.s32.totalorder %s1104_s26, %s882_s18 }
  0x52   : > { %p879_p4 = pnand %p877_p1, %p863_p11  ;;  %p885_p12 = scmp.lt.s32.totalorder %s883_s19, %s876_s29 }
  0x54   : > { %p880_p5 = pneg %p879_p4  ;;  %p886_p0 = por %p885_p12, %p884_p10 }
  0x56   : > { %p887_p2 = pnand %p886_p0, %p880_p5 }
  0x58   : > { %890 = shalt.err (!%p887_p2)
}
  0x59   : > { %753 = dma.hbm_to_vmem [thread:$0]  (!%p1100_p7), %s1098_s21, 128, %s1104_s26, %s282_s10  }
  0x5a   : > { %p1199_p13 = scmp.ne.s32.totalorder %s1196_s12, 0 }
  0x5b   : > { %s303_s20 = sand.u32 (!%p1199_p13), 1, %s921_s30   ;;  %p1200_p11 = scmp.ne.s32.totalorder (!%p1199_p13), %s1195_s11, 0 }
  0x5c   : > { %301 = sbr.rel (%p1199_p13) target bundleno = 1027 (0x403), region = 52  ;;  %s666_s17 = sshll.u32 (!%p1199_p13), %s303_s20, 3 }
  0x5d   : > { %s304_s22 = scalar_lea.sflag (!%p1199_p13), [#allocation4], %s303_s20  ;;  %s307_s14 = scalar_lea.vmem (!%p1199_p13), [#allocation3], %s666_s17 }
  0x63   : > { %908 = dma.done.wait (%p1200_p11), %s304_s22, 128  }
  0x64   : > { %910 = vsyncadd (%p1200_p11), %s304_s22, 4294967168  ;;  %p1201_p3 = scmp.eq.s32.totalorder %s1007_s6, 0 }
  0x66   : > { %912 = dma.done.wait (%p1201_p3), [#allocation6], 1280   ;;  %p1202_p6 = pmov %p1201_p3 }
  0x67   : > { %v936_v0 = vmov 0.0|0.0   ;;  %vm937_vm0 = vmmov 0   ;;  %v938_v1 = vmov 0.0   ;;  %v352_v2 = vld [vmem:[#allocation5] sm:$0xff]  ;;  %v353_v3 = vld [vmem:[#allocation5 + $0x8] sm:$0xff]  ;;  %v354_v4 = vld [vmem:[#allocation5 + $0x10] sm:$0xff]  ;;  %v437_v9 = vlaneseq }
  0x68   : > { %914 = vsyncadd (%p1202_p6), [#allocation6], 4294966016  ;;  %717 = vmatprep.subr.bf16.mxu0 %v936_v0  ;;  %699 = vmatprep.mubr.msk.f32.mxu0 %vm937_vm0, %v938_v1  ;;  %v718_v5 = vpack.c.bf16 %v353_v3, %v352_v2  ;;  %v355_v6 = vld [vmem:[#allocation5 + $0x18] sm:$0xff]  ;;  %vm363_vm1 = vcmask 261120   ;;  %v670_v11 = vld [vmem:[%s1185_s2] ss:$0 sm:$0xff] }
  0x69   : > { %723 = vmatprep.subr.bf16.mxu1 %v936_v0  ;;  %714 = vmatprep.mubr.msk.f32.mxu1 %vm937_vm0, %v938_v1  ;;  %v721_v7 = vpack.c.bf16 %v355_v6, %v354_v4  ;;  %v351_v8 = vld [vmem:[%s307_s14] sm:$0xff]  ;;  %v1142_v10 = vand.u32 127, %v437_v9  ;;  %vm443_vm3 = vcmask 359424   ;;  %v455_v22 = vld [vmem:[#allocation7] sm:$0xff]  ;;  %v456_v23 = vld [vmem:[#allocation7 + $0x8] sm:$0xff]  ;;  %vm471_vm4 = vcmask 1043456  }
  0x6a   : > { %719 = vmatpush3.bf16.msra.mxu0 %v718_v5  ;;  %v724_v24 = vpack.c.bf16 %v456_v23, %v455_v22  ;;  %v457_v25 = vld [vmem:[#allocation7 + $0x10] sm:$0xff]  ;;  %v458_v26 = vld [vmem:[#allocation7 + $0x18] sm:$0xff]  ;;  %v459_v28 = vld [vmem:[#allocation7 + $0x20] sm:$0xff]  ;;  %vm939_vm5 = vmmov 1   ;;  %s556_s23 = sld [smem:[#allocation2]]  ;;  %p347_p7 = scmp.lt.s32.totalorder %s1007_s6, 1 }
  0x6b   : > { %720 = vmatprep.subr.bf16.mxu0 %v936_v0  ;;  %vm439_vm2 = vcmp.lt.s32.totalorder %v1142_v10, 12  ;;  %v727_v27 = vpack.c.bf16 %v458_v26, %v457_v25  ;;  %v460_v29 = vld [vmem:[#allocation7 + $0x28] sm:$0xf]  ;;  %vm731_vm6 = vmpackc.low %vm471_vm4, %vm939_vm5  ;;  %v672_v34 = vld [vmem:[%s1187_s4] ss:$0 sm:$0xff] }
  0x6c   : > { %725 = vmatpush3.bf16.msra.mxu1 %v724_v24  ;;  %v730_v30 = vpack.c.bf16 %v460_v29, %v459_v28  ;;  %v675_v38 = vld [vmem:[%s1188_s5] ss:$0 sm:$0xff]  ;;  %s1208_s6 = smov (!%p347_p7, %s1007_s6), 1 }
  0x6d   : > { %726 = vmatprep.subr.bf16.mxu1 %v936_v0  ;;  %v676_v47 = vld [vmem:[%s1190_s7] ss:$0 sm:$0xff]  ;;  %s669_s15 = sshll.u32 %s1208_s6, 3 }
  0x6e   : > { %722 = vmatpush3.bf16.msra.mxu0 %v721_v7  ;;  %s350_s18 = scalar_lea.vmem %s1191_s8, %s669_s15 }
  0x70   : > { %728 = vmatpush3.bf16.msra.mxu1 %v727_v27  ;;  %v557_v41 = vstv %s556_s23 }
  0x71   : > { %700 = vmatmul.mubr.msk.f32.vlgmr.msra.gmra.mrb[0].mxu0 %vm363_vm1, %v351_v8  ;;  %729 = vmatprep.subr.bf16.mxu1 %v936_v0 }
  0x74   : > { %732 = vmatpush3.bf16.msk.msra.mxu1 %vm731_vm6, %v730_v30 }
 0x144   : > { %v433_v12 = vpop.f32.mrb[0].mxu0 }
 0x145   : > { %v434_v13 = vadd.f32 %v670_v11, %v433_v12  ;;  %v701_v14 = vpop.f32.mrb[1].mxu0 }
 0x147   : > { %v442_v15 = vsel %vm439_vm2, %v434_v13, -inf }
 0x148   : > { %v444_v16 = vsel %vm443_vm3, %v442_v15, -inf }
 0x149   : > { %445 = vmax.xlane.f32.xlu0 %v444_v16 }
 0x1d6   : > { %v446_v17 = vpop.xlane.xlu0 %445 }
 0x1d7   : > { %v447_v18 = vsub.f32 %v442_v15, %v446_v17 }
 0x1d9   : > { %v448_v19 = vmul.f32 1.442695, %v447_v18 }
 0x1db   : > { %799 = vpow2.f32 %v448_v19 }
 0x1e5   : > { %v800_v20 = vpop.eup %799 }
 0x1e6   : > { %v450_v21 = vsel %vm443_vm3, %v800_v20, 0.0 }
 0x1e7   : > { %451 = vadd.xlane.f32.xlu0 %v450_v21 }
 0x274   : > { %v452_v31 = vpop.xlane.xlu0 %451 }
 0x275   : > { %801 = vrcp.f32 %v452_v31 }
 0x27f   : > { %v802_v32 = vpop.eup %801 }
 0x280   : > { %v454_v33 = vmul.f32 %v802_v32, %v800_v20 }
 0x282   : > { %715 = vmatmul.mubr.msk.f32.vlgmr.msra.gmra.mrb[0].mxu1 %vm443_vm3, %v454_v33 }
 0x355   : > { %v541_v35 = vpop.f32.mrb[0].mxu1 }
 0x356   : > { %v542_v36 = vadd.f32 %v672_v34, %v541_v35  ;;  %v716_v37 = vpop.f32.mrb[1].mxu1 }
 0x358   : > { %v545_v39 = vmax.f32 %v542_v36, 0.0 }
 0x35a   : > { %v553_v40 = vmul.f32 %v675_v38, %v545_v39 }
 0x35c   : > { %554 = vadd.xlane.f32.xlu1 %v553_v40 }
 0x3e9   : > { %v555_v42 = vpop.xlane.xlu1 %554 }
 0x3ea   : > { %v558_v43 = vadd.f32 %v557_v41, %v555_v42 }
 0x3ec   : > { %v559_v44 = vmul.f32 0.5, %v558_v43 }
 0x3ee   : > { %803 = vtanh.f32 %v559_v44 }
 0x3f8   : > { %v804_v45 = vpop.eup %803 }
 0x3f9   : > { %v561_v46 = vadd.f32 1.0, %v804_v45 }
 0x3fb   : > { %v562_v48 = vmul.f32 0.5, %v561_v46 }
 0x3fd   : > { %v570_v49 = vmul.f32 %v676_v47, %v562_v48 }
 0x3ff   : > { %v571_v50 = vadd.f32 %v570_v49, %v434_v13 }
 0x401   : > { %v572_v51 = vsel %vm439_vm2, %v454_v33, %v571_v50 }
 0x402   : > { %573 = vst.msk [vmem:[%s350_s18] sm:$0xff] %vm443_vm3, %v572_v51 }
 0x403 PF: > { %p20_p9 = scmp.ge.s32.totalorder %s1081_s25, 4   ;;  %s1203_s29 = smov %s921_s30 }
 0x404   : > { %s1204_s30 = smov %s925_s9  ;;  %s1205_s9 = smov %s1092_s13 }
 0x405   : > { %s1206_s10 = smov %s1081_s25  ;;  %22 = sbr.rel (!%p20_p9) target bundleno = 6 (0x6), region = 100 }
 0x40c   :  { %593 = vsyncpa [#allocation4], 1 }
 0x40d   :  { %595 = vsyncpa [#allocation4 + $0x1], 1 }
 0x40e   :  { %596 = vsyncpa [#allocation6], 1 }

</bundles_post_ra>
